<compile_context>
chip_gen: v7x
topology: tpu7x:2x2x1
jax: 0.10.0
libtpu: 0.0.40
codegen_flags: <defaults>
</compile_context>

<pallas_src>
import functools

import jax
import jax.numpy as jnp
import numpy as np
from jax import lax
from jax.experimental import pallas as pl
from jax.experimental.pallas import tpu as pltpu

KH = KW = 7        # resnet50 conv1 kernel
STRIDE = 2
PAD = 3
C_IN = 3
C_OUT = 64
POOL = 3           # MaxPool2d(3, 3): kernel 3, stride 3, no padding

# 2x2 space-to-depth turns the 7x7/s2 conv into a 4x4/s1 conv.
KS = 4                       # ceil(7 / 2)
C4 = C_IN + 1                # rgb + constant "offset" channel (carries the +0.5)
CS2D = 2 * 2 * C4            # 16 channels after space-to-depth
CD = KS * CS2D               # 64 channels after wrapper-side dw duplication
KDIM = KS * CD               # 256 = im2col contraction (dh concat done in-kernel)


def _conv_relu_pool_kernel(x_ref, w_ref, o_ref, *, Wo, Wp, Tp):
    """One (image, pooled-row-tile) per grid step.

    x_ref: (1, Hs_pad, Wo, 64) bf16  dw-duplicated s2d input (full image)
    w_ref: (256, 64)           bf16  conv1 weight as matmul operand
    o_ref: (1, Tp, Wp, 64)     f32   pooled output tile
    """
    r = pl.program_id(1)                                    # pooled-row tile
    w = w_ref[...]                                          # hoisted load

    # 0/1 selection matrix picking every 3rd shifted column-max on the MXU
    # (exact: a single 1 per row, f32 accumulation).
    q = lax.broadcasted_iota(jnp.int32, (Wp, Wo - 2), 0)
    k = lax.broadcasted_iota(jnp.int32, (Wp, Wo - 2), 1)
    sel = (k == POOL * q).astype(jnp.float32)               # (Wp, Wo-2)

    def body(j, carry):
        p = r * Tp + j                                      # absolute pooled row
        # 6 s2d rows feed the 3 conv rows of this pooled row.
        rows = x_ref[0, pl.ds(POOL * p, POOL + KS - 1)]     # (6, Wo, 64) bf16
        rmax = None
        for di in range(POOL):                              # 3 conv rows
            # In-VMEM patch: 4 dh-shifted (Wo, 64) slabs, 64-lane aligned.
            patch = jnp.concatenate([rows[di + dh] for dh in range(KS)],
                                    axis=-1)                # (Wo, 256)
            c = jnp.dot(patch, w, preferred_element_type=jnp.float32)  # (Wo, 64)
            rmax = c if rmax is None else jnp.maximum(rmax, c)
        # Column pool: max of 3 sublane-shifted copies, then select cols 0,3,6,...
        m = jnp.maximum(jnp.maximum(rmax[0:Wo - 2], rmax[1:Wo - 1]), rmax[2:Wo])
        pooled = jnp.dot(sel, m, preferred_element_type=jnp.float32)   # (Wp, 64)
        # ReLU commutes with max-pool; write the pooled row straight out.
        o_ref[0, j] = jnp.maximum(pooled, 0.0).astype(o_ref.dtype)
        return carry

    lax.fori_loop(0, Tp, body, 0)


def net_forward(x_nhwc, w_oihw, *, compute_dtype=jnp.bfloat16, tile_rows=8):
    """x_nhwc: (N, H, W, 3) f32, w_oihw: (64, 3, 7, 7) f32 -> (N, Hp, Wp, 64) f32."""
    N, H, W, _ = x_nhwc.shape
    Ho = (H + 2 * PAD - KH) // STRIDE + 1
    Wo = (W + 2 * PAD - KW) // STRIDE + 1
    Hp = (Ho - POOL) // POOL + 1
    Wp = (Wo - POOL) // POOL + 1

    # Pooled-row tiling (balanced), padded output rows are sliced off below.
    n_tiles = -(-Hp // tile_rows)
    Tp = -(-Hp // n_tiles)
    n_tiles = -(-Hp // Tp)
    Hp_pad = n_tiles * Tp

    # (x/5 + 0.5) with zero padding  ==  conv over [x, ones] with weights
    # [w/5, 0.5*sum_c w]; the ones channel is 0 in the padding, exactly like
    # the original zero pad after the +0.5.  Cast to bf16 BEFORE the s2d
    # transpose (x is un-shifted -> no precision loss from the offset).
    x4 = jnp.concatenate([x_nhwc.astype(jnp.float32),
                          jnp.ones((N, H, W, 1), jnp.float32)], axis=-1)
    x4 = x4.astype(compute_dtype)

    Hpad, Wpad = H + 2 * PAD, W + 2 * PAD
    eh, ew = Hpad % 2, Wpad % 2                     # make H/W even for 2x2 s2d
    xp = jnp.pad(x4, ((0, 0), (PAD, PAD + eh), (PAD, PAD + ew), (0, 0)))
    Hs, Ws = (Hpad + eh) // 2, (Wpad + ew) // 2

    # space-to-depth: (N, Hs, Ws, 16), channel order (ph, pw, c4)
    xs = xp.reshape(N, Hs, 2, Ws, 2, C4).transpose(0, 1, 3, 2, 4, 5)
    xs = xs.reshape(N, Hs, Ws, CS2D)

    # dw duplication in the wrapper: (N, Hs, Wo, 64), lane order (dw, ph, pw, c4)
    xd = jnp.concatenate([xs[:, :, dw:dw + Wo, :] for dw in range(KS)], axis=-1)

    # Pad rows so the (padded) last pooled-row tile's 6-row reads stay in bounds.
    Hs_need = POOL * Hp_pad + POOL
    Hs_pad = max(Hs, Hs_need)
    if Hs_pad > Hs:
        xd = jnp.pad(xd, ((0, 0), (0, Hs_pad - Hs), (0, 0), (0, 0)))

    # conv1 weight -> (256, 64) matmul operand, row order (dh, dw, ph, pw, c4).
    w_f = w_oihw.astype(jnp.float32)
    w4 = jnp.concatenate([w_f * (1.0 / 5.0),
                          0.5 * jnp.sum(w_f, axis=1, keepdims=True)], axis=1)
    w4 = jnp.pad(w4, ((0, 0), (0, 0), (0, 1), (0, 1)))       # (64, 4, 8, 8)
    w4 = w4.reshape(C_OUT, C4, KS, 2, KS, 2)                 # (o, c4, dh, ph, dw, pw)
    w_mat = w4.transpose(2, 4, 3, 5, 1, 0).reshape(KDIM, C_OUT).astype(compute_dtype)

    kernel = functools.partial(_conv_relu_pool_kernel, Wo=Wo, Wp=Wp, Tp=Tp)
    out = pl.pallas_call(
        kernel,
        out_shape=jax.ShapeDtypeStruct((N, Hp_pad, Wp, C_OUT), jnp.float32),
        grid_spec=pltpu.PrefetchScalarGridSpec(
            num_scalar_prefetch=0,
            grid=(N, n_tiles),
            in_specs=[
                # Full image, constant over the row-tile axis -> DMA elided
                # across consecutive row tiles of the same image.
                pl.BlockSpec((1, Hs_pad, Wo, CD), lambda n, r: (n, 0, 0, 0)),
                pl.BlockSpec((KDIM, C_OUT), lambda n, r: (0, 0)),
            ],
            out_specs=pl.BlockSpec((1, Tp, Wp, C_OUT), lambda n, r: (n, r, 0, 0)),
        ),
        compiler_params=pltpu.CompilerParams(
            dimension_semantics=("parallel", "parallel")),
    )(xd, w_mat)
    return out[:, :Hp]


def reference(x_nhwc, w_oihw, *, quantize=False):
    """Pure-JAX reference.  quantize=True mimics the kernel's bf16 inputs
    (un-shifted x + ones channel, w/5 and offset weights in bf16)."""
    N, H, W, _ = x_nhwc.shape
    if quantize:
        x4 = jnp.concatenate([x_nhwc.astype(jnp.float32),
                              jnp.ones((N, H, W, 1), jnp.float32)], axis=-1)
        x4 = x4.astype(jnp.bfloat16).astype(jnp.float32)
        w4 = jnp.concatenate([w_oihw.astype(jnp.float32) * (1.0 / 5.0),
                              0.5 * jnp.sum(w_oihw.astype(jnp.float32), axis=1,
                                            keepdims=True)], axis=1)
        w4 = w4.astype(jnp.bfloat16).astype(jnp.float32)
        xin, w_hwio = x4, jnp.transpose(w4, (2, 3, 1, 0))
    else:
        xin = x_nhwc.astype(jnp.float32) / 5.0 + 0.5
        w_hwio = jnp.transpose(w_oihw.astype(jnp.float32), (2, 3, 1, 0))
    conv = lax.conv_general_dilated(
        xin, w_hwio, window_strides=(STRIDE, STRIDE),
        padding=((PAD, PAD), (PAD, PAD)),
        dimension_numbers=("NHWC", "HWIO", "NHWC"),
        precision=lax.Precision.HIGHEST)
    conv = jnp.maximum(conv, 0.0)
    return lax.reduce_window(conv, -jnp.inf, lax.max,
                             (1, POOL, POOL, 1), (1, POOL, POOL, 1), "VALID")


if __name__ == "__main__":
    key = jax.random.PRNGKey(0)
    kx, kw = jax.random.split(key)
    N, H, W = 2, 18, 18                                     # small NHWC input
    x = jax.random.uniform(kx, (N, H, W, C_IN), jnp.float32)
    # Deterministic synthetic stand-in for resnet50 conv1 weights (64,3,7,7);
    # conv1 has no bias and bn1 is never used in forward().
    # TODO(synk): real IMAGENET1K_V2 weights would require file/network I/O.
    w = jax.random.normal(kw, (C_OUT, C_IN, KH, KW), jnp.float32) * 0.05

    out = jax.block_until_ready(net_forward(x, w))          # (2, 3, 3, 64) NHWC
    assert out.shape == (N, 3, 3, C_OUT), out.shape

    # Strict check vs. a reference fed the same bf16-rounded inputs.
    ref_q = reference(x, w, quantize=True)
    np.testing.assert_allclose(np.asarray(out), np.asarray(ref_q),
                               rtol=2e-2, atol=2e-2)
    # Looser check vs. the pure-f32 reference (difference = bf16 quantization).
    ref = reference(x, w, quantize=False)
    np.testing.assert_allclose(np.asarray(out), np.asarray(ref),
                               rtol=5e-2, atol=5e-2)
    print("KERNEL_OK")
</pallas_src>

<mosaic_0001>
module attributes {stable_mosaic.version = 11 : i64} {
  func.func @_conv_relu_pool_kernel(%arg0: i32, %arg1: i32, %arg2: memref<1x12x9x64xbf16, #tpu.memory_space<vmem>>, %arg3: memref<256x64xbf16, #tpu.memory_space<vmem>>, %arg4: memref<1x3x3x64xf32, #tpu.memory_space<vmem>>) attributes {dimension_semantics = [#tpu.dimension_semantics<parallel>, #tpu.dimension_semantics<parallel>], iteration_bounds = array<i64: 2, 1>, scalar_prefetch = 0 : i64, scratch_operands = 0 : i64, tpu.core_type = #tpu.core_type<tc>, window_params = [{transform_indices = @transform_0, window_bounds = array<i64: 1, 12, 9, 64>}, {pipeline_mode = #tpu.pipeline_mode<synchronous>, transform_indices = @transform_1, window_bounds = array<i64: 256, 64>}, {transform_indices = @transform_2, window_bounds = array<i64: 1, 3, 3, 64>}]} {
    %c0 = arith.constant 0 : index
    %c0_0 = arith.constant 0 : index
    %0 = vector.load %arg3[%c0, %c0_0] : memref<256x64xbf16, #tpu.memory_space<vmem>>, vector<256x64xbf16>
    %1 = tpu.iota {dimensions = array<i32: 0>} : vector<3x7xi32>
    %2 = tpu.iota {dimensions = array<i32: 1>} : vector<3x7xi32>
    %c3_i32 = arith.constant 3 : i32
    %3 = vector.broadcast %c3_i32 : i32 to vector<3x7xi32>
    %4 = arith.muli %3, %1 : vector<3x7xi32>
    %5 = arith.cmpi eq, %2, %4 : vector<3x7xi32>
    %6 = arith.extui %5 : vector<3x7xi1> to vector<3x7xi32>
    %7 = arith.sitofp %6 : vector<3x7xi32> to vector<3x7xf32>
    %c0_i32 = arith.constant 0 : i32
    %c3_i32_1 = arith.constant 3 : i32
    %8 = arith.addi %c0_i32, %c3_i32_1 : i32
    %c1_i32 = arith.constant 1 : i32
    scf.for %arg5 = %c0_i32 to %8 step %c1_i32  : i32 {
      %c3_i32_3 = arith.constant 3 : i32
      %9 = arith.muli %arg1, %c3_i32_3 : i32
      %10 = arith.addi %9, %arg5 : i32
      %c3_i32_4 = arith.constant 3 : i32
      %11 = arith.muli %c3_i32_4, %10 : i32
      %c0_5 = arith.constant 0 : index
      %12 = arith.index_cast %11 : i32 to index
      %c0_6 = arith.constant 0 : index
      %c0_7 = arith.constant 0 : index
      %13 = vector.load %arg2[%c0_5, %12, %c0_6, %c0_7] : memref<1x12x9x64xbf16, #tpu.memory_space<vmem>>, vector<1x6x9x64xbf16>
      %14 = vector.shape_cast %13 : vector<1x6x9x64xbf16> to vector<6x9x64xbf16>
      %15 = vector.extract_strided_slice %14 {offsets = [0, 0, 0], sizes = [1, 9, 64], strides = [1, 1, 1]} : vector<6x9x64xbf16> to vector<1x9x64xbf16>
      %16 = vector.shape_cast %15 : vector<1x9x64xbf16> to vector<9x64xbf16>
      %17 = vector.extract_strided_slice %14 {offsets = [1, 0, 0], sizes = [1, 9, 64], strides = [1, 1, 1]} : vector<6x9x64xbf16> to vector<1x9x64xbf16>
      %18 = vector.shape_cast %17 : vector<1x9x64xbf16> to vector<9x64xbf16>
      %19 = vector.extract_strided_slice %14 {offsets = [2, 0, 0], sizes = [1, 9, 64], strides = [1, 1, 1]} : vector<6x9x64xbf16> to vector<1x9x64xbf16>
      %20 = vector.shape_cast %19 : vector<1x9x64xbf16> to vector<9x64xbf16>
      %21 = vector.extract_strided_slice %14 {offsets = [3, 0, 0], sizes = [1, 9, 64], strides = [1, 1, 1]} : vector<6x9x64xbf16> to vector<1x9x64xbf16>
      %22 = vector.shape_cast %21 : vector<1x9x64xbf16> to vector<9x64xbf16>
      %23 = tpu.concatenate %16, %18, %20, %22 in 1 : vector<9x64xbf16>, vector<9x64xbf16>, vector<9x64xbf16>, vector<9x64xbf16> -> vector<9x256xbf16>
      %cst = arith.constant dense<0.000000e+00> : vector<9x64xf32>
      %24 = tpu.matmul %23, %0, %cst {dimension_numbers = #tpu.dot_dimension_numbers<[1], [0], [0], [1], [0, 0, 1, 1], [], []>} : vector<9x256xbf16>, vector<256x64xbf16>, vector<9x64xf32> -> vector<9x64xf32>
      %25 = vector.extract_strided_slice %14 {offsets = [1, 0, 0], sizes = [1, 9, 64], strides = [1, 1, 1]} : vector<6x9x64xbf16> to vector<1x9x64xbf16>
      %26 = vector.shape_cast %25 : vector<1x9x64xbf16> to vector<9x64xbf16>
      %27 = vector.extract_strided_slice %14 {offsets = [2, 0, 0], sizes = [1, 9, 64], strides = [1, 1, 1]} : vector<6x9x64xbf16> to vector<1x9x64xbf16>
      %28 = vector.shape_cast %27 : vector<1x9x64xbf16> to vector<9x64xbf16>
      %29 = vector.extract_strided_slice %14 {offsets = [3, 0, 0], sizes = [1, 9, 64], strides = [1, 1, 1]} : vector<6x9x64xbf16> to vector<1x9x64xbf16>
      %30 = vector.shape_cast %29 : vector<1x9x64xbf16> to vector<9x64xbf16>
      %31 = vector.extract_strided_slice %14 {offsets = [4, 0, 0], sizes = [1, 9, 64], strides = [1, 1, 1]} : vector<6x9x64xbf16> to vector<1x9x64xbf16>
      %32 = vector.shape_cast %31 : vector<1x9x64xbf16> to vector<9x64xbf16>
      %33 = tpu.concatenate %26, %28, %30, %32 in 1 : vector<9x64xbf16>, vector<9x64xbf16>, vector<9x64xbf16>, vector<9x64xbf16> -> vector<9x256xbf16>
      %cst_8 = arith.constant dense<0.000000e+00> : vector<9x64xf32>
      %34 = tpu.matmul %33, %0, %cst_8 {dimension_numbers = #tpu.dot_dimension_numbers<[1], [0], [0], [1], [0, 0, 1, 1], [], []>} : vector<9x256xbf16>, vector<256x64xbf16>, vector<9x64xf32> -> vector<9x64xf32>
      %35 = arith.maximumf %24, %34 : vector<9x64xf32>
      %36 = vector.extract_strided_slice %14 {offsets = [2, 0, 0], sizes = [1, 9, 64], strides = [1, 1, 1]} : vector<6x9x64xbf16> to vector<1x9x64xbf16>
      %37 = vector.shape_cast %36 : vector<1x9x64xbf16> to vector<9x64xbf16>
      %38 = vector.extract_strided_slice %14 {offsets = [3, 0, 0], sizes = [1, 9, 64], strides = [1, 1, 1]} : vector<6x9x64xbf16> to vector<1x9x64xbf16>
      %39 = vector.shape_cast %38 : vector<1x9x64xbf16> to vector<9x64xbf16>
      %40 = vector.extract_strided_slice %14 {offsets = [4, 0, 0], sizes = [1, 9, 64], strides = [1, 1, 1]} : vector<6x9x64xbf16> to vector<1x9x64xbf16>
      %41 = vector.shape_cast %40 : vector<1x9x64xbf16> to vector<9x64xbf16>
      %42 = vector.extract_strided_slice %14 {offsets = [5, 0, 0], sizes = [1, 9, 64], strides = [1, 1, 1]} : vector<6x9x64xbf16> to vector<1x9x64xbf16>
      %43 = vector.shape_cast %42 : vector<1x9x64xbf16> to vector<9x64xbf16>
      %44 = tpu.concatenate %37, %39, %41, %43 in 1 : vector<9x64xbf16>, vector<9x64xbf16>, vector<9x64xbf16>, vector<9x64xbf16> -> vector<9x256xbf16>
      %cst_9 = arith.constant dense<0.000000e+00> : vector<9x64xf32>
      %45 = tpu.matmul %44, %0, %cst_9 {dimension_numbers = #tpu.dot_dimension_numbers<[1], [0], [0], [1], [0, 0, 1, 1], [], []>} : vector<9x256xbf16>, vector<256x64xbf16>, vector<9x64xf32> -> vector<9x64xf32>
      %46 = arith.maximumf %35, %45 : vector<9x64xf32>
      %47 = vector.extract_strided_slice %46 {offsets = [0, 0], sizes = [7, 64], strides = [1, 1]} : vector<9x64xf32> to vector<7x64xf32>
      %48 = vector.extract_strided_slice %46 {offsets = [1, 0], sizes = [7, 64], strides = [1, 1]} : vector<9x64xf32> to vector<7x64xf32>
      %49 = arith.maximumf %47, %48 : vector<7x64xf32>
      %50 = vector.extract_strided_slice %46 {offsets = [2, 0], sizes = [7, 64], strides = [1, 1]} : vector<9x64xf32> to vector<7x64xf32>
      %51 = arith.maximumf %49, %50 : vector<7x64xf32>
      %cst_10 = arith.constant dense<0.000000e+00> : vector<3x64xf32>
      %52 = tpu.matmul %7, %51, %cst_10 {dimension_numbers = #tpu.dot_dimension_numbers<[1], [0], [0], [1], [0, 0, 1, 1], [], []>} : vector<3x7xf32>, vector<7x64xf32>, vector<3x64xf32> -> vector<3x64xf32>
      %cst_11 = arith.constant 0.000000e+00 : f32
      %53 = vector.broadcast %cst_11 : f32 to vector<3x64xf32>
      %54 = arith.maximumf %52, %53 : vector<3x64xf32>
      %c0_12 = arith.constant 0 : index
      %55 = arith.index_cast %arg5 : i32 to index
      %c0_13 = arith.constant 0 : index
      %c0_14 = arith.constant 0 : index
      %56 = vector.load %arg4[%c0_12, %55, %c0_13, %c0_14] : memref<1x3x3x64xf32, #tpu.memory_space<vmem>>, vector<1x1x3x64xf32>
      %57 = vector.shape_cast %56 : vector<1x1x3x64xf32> to vector<3x64xf32>
      %58 = vector.shape_cast %54 : vector<3x64xf32> to vector<1x1x3x64xf32>
      tpu.vector_store %arg4[%c0_12, %55, %c0_13, %c0_14], %58 {strides = array<i32>} : memref<1x3x3x64xf32, #tpu.memory_space<vmem>>, vector<1x1x3x64xf32>,
    }
    %c3_i32_2 = arith.constant 3 : i32
    return
  }
  func.func @transform_0(%arg0: i32, %arg1: i32) -> (i32, i32, i32, i32) {
    %c0_i32 = arith.constant 0 : i32
    %c0_i32_0 = arith.constant 0 : i32
    %c0_i32_1 = arith.constant 0 : i32
    %c0_i32_2 = arith.constant 0 : i32
    return %arg0, %c0_i32, %c0_i32_0, %c0_i32_1 : i32, i32, i32, i32
  }
  func.func @transform_1(%arg0: i32, %arg1: i32) -> (i32, i32) {
    %c0_i32 = arith.constant 0 : i32
    %c0_i32_0 = arith.constant 0 : i32
    %c0_i32_1 = arith.constant 0 : i32
    return %c0_i32, %c0_i32_0 : i32, i32
  }
  func.func @transform_2(%arg0: i32, %arg1: i32) -> (i32, i32, i32, i32) {
    %c0_i32 = arith.constant 0 : i32
    %c0_i32_0 = arith.constant 0 : i32
    %c0_i32_1 = arith.constant 0 : i32
    return %arg0, %arg1, %c0_i32, %c0_i32_0 : i32, i32, i32, i32
  }
}

</mosaic_0001>

<bundles_post_ra>
// kernel: tpu_custom_call.1
= control target key start
LH: loop header
LB: loop body
LE: loop exit
PB: predicated region body
PF: predicated region fallthrough
CT: control target
= control target key end

     0   :  { %s908_s9 = smov 0   ;;  %s910_s10 = smov 0   ;;  %s1194_s0 = inlined_call_operand.vmem [shape: bf16[2,12,9,64], index: 0, kind: input, shape index: {}]   ;;  %s1195_s1 = inlined_call_operand.vmem [shape: bf16[256,64], index: 1, kind: input, shape index: {}]   ;;  %s1196_s2 = inlined_call_operand.vmem [shape: f32[2,3,3,64], index: 2, kind: output, shape index: {}]  }
   0x1   :  { %s912_s11 = smov 0  }
   0x2 LB: > { %s24_s12 = sadd.s32 1, %s879_s10  ;;  %p706_p0 = scmp.ge.s32.totalorder %s883_s11, 1  ;;  %s883_s11 = sphi %s912_s11, %s12_s11   ;;  %s879_s10 = sphi %s910_s10, %s1198_s10   ;;  %s875_s9 = sphi %s908_s9, %s1197_s9  }
   0x3   : > { %p26_p1 = scmp.ge.s32.totalorder %s24_s12, 2  ;;  %p126_p2 = scmp.lt.s32.totalorder %s883_s11, 3 }
   0x5   : > { %s1200_s12 = smov (%p26_p1, %s24_s12), 0  ;;  %p127_p3 = pnand %p706_p0, %p126_p2 }
   0x6   : > { %p152_p4 = scmp.lt.s32.totalorder (!%p127_p3), %s875_s9, 1  ;;  %v929_v0 = vld [vmem:[%s1195_s1] sm:$0xf] (!%p127_p3)  ;;  %v934_v1 = vld [vmem:[%s1195_s1 + $0x4] sm:$0xf] (!%p127_p3)  ;;  %v200_v2 = vlaneseq (!%p127_p3)  ;;  %v889_v36 = vmov (!%p127_p3), 0.0  }
   0x7   : > { %130 = sbr.rel (%p127_p3) target bundleno = 616 (0x268), region = 28  ;;  %v939_v3 = vld [vmem:[%s1195_s1 + $0x8] sm:$0xf] (!%p127_p3)  ;;  %v944_v4 = vld [vmem:[%s1195_s1 + $0xc] sm:$0xf] (!%p127_p3)  ;;  %s1098_s13 = smov (!%p127_p3), 0  }
   0x8   : > { %v949_v5 = vld [vmem:[%s1195_s1 + $0x10] sm:$0xf] (!%p127_p3)  ;;  %v954_v6 = vld [vmem:[%s1195_s1 + $0x14] sm:$0xf] (!%p127_p3)  ;;  %v959_v7 = vld [vmem:[%s1195_s1 + $0x18] sm:$0xf] (!%p127_p3) }
   0x9   : > { %v201_v8 = vshrl.u32 (!%p127_p3), %v200_v2, 7  ;;  %v964_v9 = vld [vmem:[%s1195_s1 + $0x1c] sm:$0xf] (!%p127_p3)  ;;  %v969_v10 = vld [vmem:[%s1195_s1 + $0x20] sm:$0xf] (!%p127_p3)  ;;  %v203_v14 = vand.u32 (!%p127_p3), 127, %v200_v2 }
   0xa   : > { %v974_v11 = vld [vmem:[%s1195_s1 + $0x24] sm:$0xf] (!%p127_p3)  ;;  %v979_v12 = vld [vmem:[%s1195_s1 + $0x28] sm:$0xf] (!%p127_p3)  ;;  %v984_v13 = vld [vmem:[%s1195_s1 + $0x2c] sm:$0xf] (!%p127_p3) }
   0xb   : > { %v989_v15 = vld [vmem:[%s1195_s1 + $0x30] sm:$0xf] (!%p127_p3)  ;;  %v994_v16 = vld [vmem:[%s1195_s1 + $0x34] sm:$0xf] (!%p127_p3)  ;;  %v204_v17 = vmul.u32 (!%p127_p3), 3, %v201_v8 }
   0xc   : > { %v1004_v18 = vld [vmem:[%s1195_s1 + $0x38] sm:$0xf] (!%p127_p3)  ;;  %v1009_v19 = vld [vmem:[%s1195_s1 + $0x3c] sm:$0xf] (!%p127_p3)  ;;  %v1014_v20 = vld [vmem:[%s1195_s1 + $0x40] sm:$0xf] (!%p127_p3) }
   0xd   : > { %v1024_v21 = vld [vmem:[%s1195_s1 + $0x44] sm:$0xf] (!%p127_p3)  ;;  %v1029_v22 = vld [vmem:[%s1195_s1 + $0x48] sm:$0xf] (!%p127_p3)  ;;  %v1034_v23 = vld [vmem:[%s1195_s1 + $0x4c] sm:$0xf] (!%p127_p3)  ;;  %vm205_vm0 = vcmp.eq.s32.totalorder (!%p127_p3), %v203_v14, %v204_v17 }
   0xe   : > { %s1202_s9 = smov (!%p152_p4, %s875_s9), 1  ;;  %v1039_v24 = vld [vmem:[%s1195_s1 + $0x50] sm:$0xf]  ;;  %v1044_v25 = vld [vmem:[%s1195_s1 + $0x54] sm:$0xf]  ;;  %v1096_v37 = vsel %vm205_vm0, 1.0, %v889_v36 }
   0xf   : > { %s813_s5 = smul.u32 96, %s1202_s9  ;;  %v1049_v26 = vld [vmem:[%s1195_s1 + $0x58] sm:$0xf]  ;;  %v1054_v27 = vld [vmem:[%s1195_s1 + $0x5c] sm:$0xf] }
  0x10   : > { %s814_s14 = smul.u32 12, %s1202_s9  ;;  %v1059_v28 = vld [vmem:[%s1195_s1 + $0x60] sm:$0xf]  ;;  %v1064_v29 = vld [vmem:[%s1195_s1 + $0x64] sm:$0xf] }
  0x11   : > { %s999_s21 = scalar_lea.vmem %s1194_s0, %s813_s5  ;;  %v1069_v30 = vld [vmem:[%s1195_s1 + $0x68] sm:$0xf]  ;;  %v1074_v31 = vld [vmem:[%s1195_s1 + $0x6c] sm:$0xf]  ;;  %v1079_v32 = vld [vmem:[%s1195_s1 + $0x70] sm:$0xf] }
  0x12   : > { %s1019_s29 = scalar_lea.vmem %s1196_s2, %s814_s14  ;;  %v1084_v33 = vld [vmem:[%s1195_s1 + $0x74] sm:$0xf]  ;;  %v1089_v34 = vld [vmem:[%s1195_s1 + $0x78] sm:$0xf]  ;;  %v1094_v35 = vld [vmem:[%s1195_s1 + $0x7c] sm:$0xf] }
  0x13 LB: >> { %v724_v38 = vcombine.low %v1014_v20, %v1024_v21  ;;  %v1107_v39 = vcombine.low %v929_v0, %v934_v1  ;;  %v1111_v40 = vcombine.low %v1029_v22, %v1034_v23  ;;  %s739_s14 = smul.u32 24, %s887_s13  ;;  %v1118_v41 = vcombine.low %v939_v3, %v944_v4  ;;  %s890_s16 = smov 64   ;;  %s887_s13 = sphi %s1098_s13, %s213_s13  }
  0x14   : >> { %v1130_v43 = vcombine.low %v1039_v24, %v1044_v25  ;;  %v1138_v46 = vcombine.low %v949_v5, %v954_v6  ;;  %v727_v48 = vcombine.low %v1049_v26, %v1054_v27  ;;  %v719_v49 = vcombine.low %v959_v7, %v964_v9  ;;  %s736_s17 = sshll.u32 %s887_s13, 2  ;;  %s213_s13 = sadd.s32 1, %s887_s13  }
  0x15   : >> { %740 = vmatprep.subr.bf16.mxu0 %v724_v38  ;;  %762 = vmatprep.subr.bf16.mxu1 %v724_v38  ;;  %s1121_s15 = scalar_lea.vmem %s999_s21, %s739_s14  ;;  %v728_v51 = vcombine.low %v1059_v28, %v1064_v29  ;;  %v720_v52 = vcombine.low %v969_v10, %v974_v11  ;;  %v729_v53 = vcombine.low %v1069_v30, %v1074_v31  ;;  %vm256_vm1 = vcmask 523264   ;;  %s607_s18 = scalar_lea.vmem %s1019_s29, %s736_s17 }
  0x16   : >> { %741 = vmatpush3.bf16.msra.mxu0 %v1107_v39  ;;  %763 = vmatpush3.bf16.msra.mxu1 %v1107_v39  ;;  %v1126_v42 = vld [vmem:[%s1121_s15 + $0x20] sm:$0x1f]   ;;  %v852_v44 = vld [vmem:[%s1121_s15 + $0x18] sm:$0x1f]   ;;  %v853_v45 = vld [vmem:[%s1121_s15 + $0x10] sm:$0x1f]   ;;  %v721_v54 = vcombine.low %v979_v12, %v984_v13  ;;  %v730_v55 = vcombine.low %v1079_v32, %v1084_v33  ;;  %v722_v56 = vcombine.low %v989_v15, %v994_v16 }
  0x17   : >> { %742 = vmatprep.subr.bf16.mxu0 %v1111_v40  ;;  %764 = vmatprep.subr.bf16.mxu1 %v1111_v40  ;;  %v854_v47 = vld [vmem:[%s1121_s15 + $0x8] sm:$0x1f]   ;;  %v731_v57 = vcombine.low %v1089_v34, %v1094_v35  ;;  %v723_v58 = vcombine.low %v1004_v18, %v1009_v19  ;;  %v856_v63 = vld [vmem:[%s1121_s15] sm:$0x1f]   ;;  %vm892_vm2 = vmmov 0   ;;  %vm521_vm3 = vcmask 1045504  }
  0x18   : >> { %409 = vrot.lane.b32.xlu1 %v1126_v42, %s890_s16  ;;  %254 = vrot.lane.b32.xlu0 %v852_v44, %s890_s16  ;;  %v855_v50 = vld [vmem:[%s1121_s15 + $0x28] sm:$0x1f]   ;;  %vm531_vm4 = vcmask 1046528   ;;  %vm527_vm5 = vcmask 56320   ;;  %vm608_vm6 = vcmask 518144   ;;  %p210_p5 = scmp.ge.s32.totalorder %s213_s13, 3  }
  0x1a   : >> { %743 = vmatpush3.bf16.msra.mxu0 %v1118_v41  ;;  %765 = vmatpush3.bf16.msra.mxu1 %v1118_v41 }
  0x1b   : >> { %744 = vmatprep.subr.bf16.mxu0 %v1130_v43  ;;  %766 = vmatprep.subr.bf16.mxu1 %v1130_v43 }
  0x1c   : >> { %402 = vrot.lane.b32.xlu1 %v853_v45, %s890_s16  ;;  %242 = vrot.lane.b32.xlu0 %v854_v47, %s890_s16 }
  0x1e   : >> { %745 = vmatpush3.bf16.msra.mxu0 %v1138_v46  ;;  %767 = vmatpush3.bf16.msra.mxu1 %v1138_v46 }
  0x1f   : >> { %746 = vmatprep.subr.bf16.mxu0 %v727_v48  ;;  %768 = vmatprep.subr.bf16.mxu1 %v727_v48 }
  0x20   : >> { %467 = vrot.lane.b32.xlu0 %v855_v50, %s890_s16 }
  0x22   : >> { %747 = vmatpush3.bf16.msra.mxu0 %v719_v49  ;;  %769 = vmatpush3.bf16.msra.mxu1 %v719_v49 }
  0x23   : >> { %748 = vmatprep.subr.bf16.mxu0 %v728_v51  ;;  %770 = vmatprep.subr.bf16.mxu1 %v728_v51 }
  0x26   : >> { %749 = vmatpush3.bf16.msra.mxu0 %v720_v52  ;;  %771 = vmatpush3.bf16.msra.mxu1 %v720_v52 }
  0x27   : >> { %750 = vmatprep.subr.bf16.mxu0 %v729_v53  ;;  %772 = vmatprep.subr.bf16.mxu1 %v729_v53 }
  0x2a   : >> { %751 = vmatpush3.bf16.msra.mxu0 %v721_v54  ;;  %773 = vmatpush3.bf16.msra.mxu1 %v721_v54 }
  0x2b   : >> { %752 = vmatprep.subr.bf16.mxu0 %v730_v55  ;;  %774 = vmatprep.subr.bf16.mxu1 %v730_v55 }
  0x2e   : >> { %753 = vmatpush3.bf16.msra.mxu0 %v722_v56  ;;  %775 = vmatpush3.bf16.msra.mxu1 %v722_v56 }
  0x2f   : >> { %754 = vmatprep.subr.bf16.mxu0 %v731_v57  ;;  %776 = vmatprep.subr.bf16.mxu1 %v731_v57 }
  0x32   : >> { %755 = vmatpush3.bf16.msra.mxu0 %v723_v58  ;;  %777 = vmatpush3.bf16.msra.mxu1 %v723_v58 }
  0x33   : >> { %784 = vmatprep.subr.bf16.mxu0 %v724_v38 }
  0x8a   : >> { %v410_v59 = vpop.permute.xlu1 %409  ;;  %v255_v60 = vpop.permute.xlu0 %254 }
  0x8b   : >> { %v417_v61 = vsel %vm256_vm1, %v852_v44, %v410_v59  ;;  %v263_v62 = vsel %vm256_vm1, %v853_v45, %v255_v60 }
  0x8c   : >> { %451 = vmatprep.mubr.bf16.mxu1 %v417_v61  ;;  %393 = vmatprep.mubr.bf16.mxu0 %v263_v62 }
  0x8e   : >> { %v403_v2 = vpop.permute.xlu1 %402  ;;  %v243_v8 = vpop.permute.xlu0 %242 }
  0x8f   : >> { %v413_v14 = vsel %vm256_vm1, %v854_v47, %v403_v2  ;;  %v259_v17 = vsel %vm256_vm1, %v856_v63, %v243_v8 }
  0x90   : >> { %452 = vmatmul.mubr.bf16.vlgmr.msra.gmra.mrb[0].mxu1 %v413_v14  ;;  %394 = vmatmul.mubr.bf16.vlgmr.msra.gmra.mrb[0].mxu0 %v259_v17 }
  0x91   : >> { %785 = vmatpush3.bf16.msra.mxu0 %v1107_v39  ;;  %v891_v39 = vmov 0.0  }
  0x92   : >> { %786 = vmatprep.subr.bf16.mxu0 %v1111_v40  ;;  %v468_v36 = vpop.permute.xlu0 %467  ;;  %808 = vmatprep.subr.mxu1 %v891_v39 }
  0x93   : >> { %v471_v38 = vsel %vm256_vm1, %v1126_v42, %v468_v36  ;;  %810 = vmatprep.mubr.msk.f32.mxu1 %vm892_vm2, %v891_v39 }
  0x94   : >> { %505 = vmatprep.mubr.bf16.mxu0 %v471_v38 }
  0x95   : >> { %787 = vmatpush3.bf16.msra.mxu0 %v1118_v41 }
  0x96   : >> { %788 = vmatprep.subr.bf16.mxu0 %v1130_v43 }
  0x99   : >> { %789 = vmatpush3.bf16.msra.mxu0 %v1138_v46 }
  0x9a   : >> { %790 = vmatprep.subr.bf16.mxu0 %v727_v48 }
  0x9d   : >> { %791 = vmatpush3.bf16.msra.mxu0 %v719_v49 }
  0x9e   : >> { %792 = vmatprep.subr.bf16.mxu0 %v728_v51 }
  0xa1   : >> { %793 = vmatpush3.bf16.msra.mxu0 %v720_v52 }
  0xa2   : >> { %794 = vmatprep.subr.bf16.mxu0 %v729_v53 }
  0xa5   : >> { %795 = vmatpush3.bf16.msra.mxu0 %v721_v54 }
  0xa6   : >> { %796 = vmatprep.subr.bf16.mxu0 %v730_v55 }
  0xa9   : >> { %797 = vmatpush3.bf16.msra.mxu0 %v722_v56 }
  0xaa   : >> { %798 = vmatprep.subr.bf16.mxu0 %v731_v57 }
  0xad   : >> { %799 = vmatpush3.bf16.msra.mxu0 %v723_v58 }
  0xb0   : >> { %506 = vmatmul.mubr.bf16.vlgmr.msra.gmra.mrb[4].mxu0 %v263_v62 }
 0x163   : >> { %v778_v40 = vpop.f32.mrb[0].mxu1  ;;  %v756_v41 = vpop.f32.mrb[0].mxu0 }
 0x164   : >> { %v779_v42 = vpop.f32.mrb[1].mxu1  ;;  %v757_v43 = vpop.f32.mrb[1].mxu0 }
 0x165   : >> { %v780_v44 = vadd.f32 %v779_v42, %v778_v40  ;;  %v781_v45 = vpop.f32.mrb[2].mxu1  ;;  %v758_v46 = vadd.f32 %v757_v43, %v756_v41  ;;  %v759_v47 = vpop.f32.mrb[2].mxu0 }
 0x166   : >> { %v782_v48 = vpop.f32.mrb[3].mxu1  ;;  %v760_v49 = vpop.f32.mrb[3].mxu0 }
 0x167   : >> { %v783_v50 = vadd.f32 %v782_v48, %v781_v45  ;;  %v460_v51 = vmax.f32 %v758_v46, %v780_v44  ;;  %v761_v52 = vadd.f32 %v760_v49, %v759_v47 }
 0x169   : >> { %v461_v53 = vmax.f32 %v761_v52, %v783_v50 }
 0x183   : >> { %v800_v54 = vpop.f32.mrb[4].mxu0 }
 0x184   : >> { %v801_v55 = vpop.f32.mrb[5].mxu0 }
 0x185   : >> { %v802_v56 = vadd.f32 %v801_v55, %v800_v54  ;;  %v803_v57 = vpop.f32.mrb[6].mxu0 }
 0x186   : >> { %v804_v58 = vpop.f32.mrb[7].mxu0 }
 0x187   : >> { %v514_v59 = vmax.f32 %v460_v51, %v802_v56  ;;  %v805_v60 = vadd.f32 %v804_v58, %v803_v57 }
 0x189   : >> { %v517_v61 = vrot.slane %v514_v59, 1  ;;  %v515_v62 = vmax.f32 %v461_v53, %v805_v60  ;;  %v522_v2 = vrot.slane %v514_v59, 2 }
 0x18b   : >> { %v519_v63 = vmax.f32 %v514_v59, %v517_v61  ;;  %v523_v8 = vrot.slane %v515_v62, 2 }
 0x18d   : >> { %v524_v14 = vsel %vm521_vm3, %v522_v2, %v523_v8 }
 0x18e   : >> { %v526_v17 = vmax.f32 %v519_v63, %v524_v14 }
 0x190   : >> { %809 = vmatpush3.msk.msra.mxu1 %vm531_vm4, %v526_v17 }
 0x191   : >> { %811 = vmatmul.mubr.msk.f32.vlgmr.msra.gmra.mrb[4].mxu1 %vm527_vm5, %v1096_v37 }
 0x261   : > { %212 = sbr.rel (!%p210_p5) target bundleno = 19 (0x13), region = 67 }
 0x264   : >> { %v601_v36 = vpop.f32.mrb[4].mxu1 }
 0x265   : >> { %v605_v38 = vmax.f32 %v601_v36, 0.0  ;;  %v812_v39 = vpop.f32.mrb[5].mxu1 }
 0x267   : >> { %609 = vst.msk [vmem:[%s607_s18] sm:$0x7] %vm608_vm6, %v605_v38 }
 0x268 PF: > { %s12_s11 = sadd.s32 1, %s883_s11   ;;  %s1197_s9 = smov %s879_s10 }
 0x269   : > { %p9_p6 = scmp.ge.s32.totalorder %s12_s11, 4   ;;  %s1198_s10 = smov %s1200_s12 }
 0x26b   :  { %11 = sbr.rel (!%p9_p6) target bundleno = 2 (0x2), region = 78 }

</bundles_post_ra>
